<compile_context>
chip_gen: v7x
topology: tpu7x:2x2x1
jax: 0.10.0
libtpu: 0.0.40
codegen_flags: <defaults>
</compile_context>

<pallas_src>
import jax
import jax.numpy as jnp
from jax import lax
from jax.experimental import pallas as pl
from jax.experimental.pallas import tpu as pltpu

VOCAB = 100
DIM = 100
VOCAB_PAD = 128   # lane-aligned contraction (K) dim for the MXU
DIM_PAD = 128     # lane-dense output width -> full-width (unmasked) stores
TILE_N = 512      # tokens per grid step (multiple of 128; VMEM-safe on v7x)


def _embedding_kernel(idx_ref, table_ref, out_ref):
    # idx_ref:   (1, TILE_N)          int32  lane-dense token ids for this tile
    # table_ref: (VOCAB_PAD, DIM_PAD) f32    zero-padded table, resident across grid
    # out_ref:   (TILE_N, DIM_PAD)    f32
    idx = idx_ref[...]                                              # (1, TILE_N)
    # One-hot built in (vocab, token) orientation: idx broadcasts along
    # sublanes (cheap), iota varies along sublanes.
    row_iota = lax.broadcasted_iota(jnp.int32, (VOCAB_PAD, TILE_N), 0)
    onehot_t = (row_iota == idx).astype(jnp.float32)                # (VOCAB_PAD, TILE_N)
    # Aligned 32-bit XLU transpose -> (TILE_N, VOCAB_PAD); XLU slot is free
    # relative to the HBM-write-bound critical path.
    onehot = jnp.transpose(onehot_t, (1, 0))
    # gather == one-hot @ table on the MXU, f32 accumulate (no extra cast).
    out_ref[...] = jnp.dot(onehot, table_ref[...],
                           preferred_element_type=jnp.float32)


def embedding_forward(x, table):
    """x: integer array (any shape), values in [0, VOCAB). Returns x.shape + (DIM,)."""
    orig_shape = x.shape
    idx_flat = x.reshape(-1).astype(jnp.int32)
    n = idx_flat.shape[0]
    n_tiles = max(1, pl.cdiv(n, TILE_N))
    n_pad = n_tiles * TILE_N
    # Pad token ids (padded slots -> id 0; their rows are sliced off below) and
    # lay them out lane-dense as (1, n_pad).
    idx2d = jnp.pad(idx_flat, (0, n_pad - n)).reshape(1, n_pad)
    # Zero-pad the embedding table to (128, 128); padding must be zero so the
    # one-hot matmul and the final slice stay exact.
    table_pad = jnp.pad(table.astype(jnp.float32),
                        ((0, VOCAB_PAD - VOCAB), (0, DIM_PAD - DIM)))

    out = pl.pallas_call(
        _embedding_kernel,
        out_shape=jax.ShapeDtypeStruct((n_pad, DIM_PAD), jnp.float32),
        grid=(n_tiles,),
        in_specs=[
            # token ids: lane-dense (1, TILE_N) block per grid step
            pl.BlockSpec((1, TILE_N), lambda i: (0, i)),
            # table: same block every step -> stays resident in VMEM (no re-DMA)
            pl.BlockSpec((VOCAB_PAD, DIM_PAD), lambda i: (0, 0)),
        ],
        out_specs=pl.BlockSpec((TILE_N, DIM_PAD), lambda i: (i, 0)),
        compiler_params=pltpu.CompilerParams(
            # tiles are independent -> allow megacore sharding on v7x
            dimension_semantics=("parallel",),
        ),
    )(idx2d, table_pad)

    return out[:n, :DIM].reshape(*orig_shape, DIM)


if __name__ == "__main__":
    key = jax.random.PRNGKey(0)
    k_tab, k_idx = jax.random.split(key)
    # nn.Embedding(100, 100) default init: N(0, 1)
    table = jax.random.normal(k_tab, (VOCAB, DIM), dtype=jnp.float32)
    # Small example input: batch=2, seq=8 token ids in [0, 100)
    x = jax.random.randint(k_idx, (2, 8), 0, VOCAB, dtype=jnp.int32)

    out = embedding_forward(x, table)
    out = jax.block_until_ready(out)

    # Reference check (plain JAX gather)
    ref = jnp.take(table, x, axis=0)
    assert out.shape == (2, 8, DIM), out.shape
    assert jnp.allclose(out, ref, atol=1e-5), "mismatch vs reference gather"

    print("KERNEL_OK")
</pallas_src>

<mosaic_0001>
module attributes {stable_mosaic.version = 11 : i64} {
  func.func @_embedding_kernel(%arg0: i32, %arg1: memref<1x512xi32, #tpu.memory_space<vmem>>, %arg2: memref<128x128xf32, #tpu.memory_space<vmem>>, %arg3: memref<512x128xf32, #tpu.memory_space<vmem>>) attributes {dimension_semantics = [#tpu.dimension_semantics<parallel>], iteration_bounds = array<i64: 1>, scalar_prefetch = 0 : i64, scratch_operands = 0 : i64, tpu.core_type = #tpu.core_type<tc>, window_params = [{transform_indices = @transform_0, window_bounds = array<i64: 1, 512>}, {pipeline_mode = #tpu.pipeline_mode<synchronous>, transform_indices = @transform_1, window_bounds = array<i64: 128, 128>}, {transform_indices = @transform_2, window_bounds = array<i64: 512, 128>}]} {
    %c0 = arith.constant 0 : index
    %c0_0 = arith.constant 0 : index
    %0 = vector.load %arg1[%c0, %c0_0] : memref<1x512xi32, #tpu.memory_space<vmem>>, vector<1x512xi32>
    %1 = tpu.iota {dimensions = array<i32: 0>} : vector<128x512xi32>
    %2 = vector.broadcast %0 : vector<1x512xi32> to vector<128x512xi32>
    %3 = arith.cmpi eq, %1, %2 : vector<128x512xi32>
    %4 = arith.extui %3 : vector<128x512xi1> to vector<128x512xi32>
    %5 = arith.sitofp %4 : vector<128x512xi32> to vector<128x512xf32>
    %6 = tpu.transpose %5, [1, 0] : vector<128x512xf32> -> vector<512x128xf32>
    %c0_1 = arith.constant 0 : index
    %c0_2 = arith.constant 0 : index
    %7 = vector.load %arg2[%c0_1, %c0_2] : memref<128x128xf32, #tpu.memory_space<vmem>>, vector<128x128xf32>
    %cst = arith.constant dense<0.000000e+00> : vector<512x128xf32>
    %8 = tpu.matmul %6, %7, %cst {dimension_numbers = #tpu.dot_dimension_numbers<[1], [0], [0], [1], [0, 0, 1, 1], [], []>} : vector<512x128xf32>, vector<128x128xf32>, vector<512x128xf32> -> vector<512x128xf32>
    %c0_3 = arith.constant 0 : index
    %c0_4 = arith.constant 0 : index
    %9 = vector.load %arg3[%c0_3, %c0_4] : memref<512x128xf32, #tpu.memory_space<vmem>>, vector<512x128xf32>
    tpu.vector_store %arg3[%c0_3, %c0_4], %8 {strides = array<i32>} : memref<512x128xf32, #tpu.memory_space<vmem>>, vector<512x128xf32>,
    return
  }
  func.func @transform_0(%arg0: i32) -> (i32, i32) {
    %c0_i32 = arith.constant 0 : i32
    %c0_i32_0 = arith.constant 0 : i32
    return %c0_i32, %arg0 : i32, i32
  }
  func.func @transform_1(%arg0: i32) -> (i32, i32) {
    %c0_i32 = arith.constant 0 : i32
    %c0_i32_0 = arith.constant 0 : i32
    %c0_i32_1 = arith.constant 0 : i32
    return %c0_i32, %c0_i32_0 : i32, i32
  }
  func.func @transform_2(%arg0: i32) -> (i32, i32) {
    %c0_i32 = arith.constant 0 : i32
    %c0_i32_0 = arith.constant 0 : i32
    return %arg0, %c0_i32 : i32, i32
  }
}

</mosaic_0001>

<bundles_post_ra>
// kernel: tpu_custom_call.1
= control target key start
LH: loop header
LB: loop body
LE: loop exit
PB: predicated region body
PF: predicated region fallthrough
CT: control target
= control target key end

     0   :  { %7 = vsyncpa [#allocation3], 0  ;;  %s1860_s0 = inlined_call_operand.hbm [shape: s32[1,512], index: 0, kind: input, shape index: {}]   ;;  %s1861_s1 = inlined_call_operand.hbm [shape: f32[128,128], index: 1, kind: input, shape index: {}]   ;;  %s1862_s2 = inlined_call_operand.hbm [shape: f32[512,128], index: 2, kind: output, shape index: {}]  }
   0x1   :  { %8 = vsyncpa [#allocation6], 0 }
   0x2   :  { %9 = vsyncpa [#allocation4], 0  ;;  %s1497_s9 = smov [#allocation2]   ;;  %s1498_s11 = smov [#allocation5]  }
   0x3   :  { %s16_s10 = sshll.u32 %s1497_s9, 4  ;;  %s25_s12 = sshll.u32 %s1498_s11, 4  ;;  %s17_s10 = int_to_ptr.vmem [resolvable:$true] %s16_s10  ;;  %s1518_s12 = int_to_ptr.vmem [resolvable:$true] %s25_s12 }
   0x4   :  { %s1425_s15 = scalar_lea.hbm %s1860_s0, 64 }
   0x5   :  { %p1426_p0 = scmp.ne.s32.totalorder %s1860_s0, %s1425_s15  ;;  %p1429_p1 = scmp.lt.u32.totalorder %s1425_s15, %s1860_s0 }
   0x7   :  { %p1431_p2 = pnand %p1429_p1, %p1426_p0 }
   0x9   :  { %1434 = shalt.err (!%p1431_p2)
}
   0xa   :  { %s1435_s20 = scalar_lea.vmem %s17_s10, 64  ;;  %p1440_p4 = scmp.lt.s32.totalorder %s17_s10, %s17_s10 }
   0xb   :  { %p1436_p3 = scmp.ne.s32.totalorder %s17_s10, %s1435_s20  ;;  %p1441_p5 = scmp.lt.s32.totalorder %s1435_s20, %s1435_s20 }
   0xd   :  { %p1442_p6 = por %p1441_p5, %p1440_p4 }
   0xf   :  { %p1443_p7 = pnand %p1442_p6, %p1436_p3 }
  0x11   :  { %1446 = shalt.err (!%p1443_p7)
}
  0x12   :  { %19 = dma.hbm_to_vmem [thread:$0]  %s1860_s0, 64, %s17_s10, [#allocation3]  }
  0x13   :  { %s1447_s25 = scalar_lea.hbm %s1861_s1, 2048 }
  0x14   :  { %p1448_p8 = scmp.ne.s32.totalorder %s1861_s1, %s1447_s25  ;;  %p1451_p9 = scmp.lt.u32.totalorder %s1447_s25, %s1861_s1 }
  0x16   :  { %p1453_p10 = pnand %p1451_p9, %p1448_p8 }
  0x18   :  { %1456 = shalt.err (!%p1453_p10)
}
  0x19   :  { %s1457_s30 = scalar_lea.vmem %s1518_s12, 2048  ;;  %p1462_p12 = scmp.lt.s32.totalorder %s1518_s12, %s1518_s12 }
  0x1a   :  { %p1458_p11 = scmp.ne.s32.totalorder %s1518_s12, %s1457_s30  ;;  %p1463_p13 = scmp.lt.s32.totalorder %s1457_s30, %s1457_s30 }
  0x1c   :  { %p1464_p0 = por %p1463_p13, %p1462_p12 }
  0x1e   :  { %p1465_p1 = pnand %p1464_p0, %p1458_p11 }
  0x20   :  { %1468 = shalt.err (!%p1465_p1)
}
  0x21   :  { %s1499_s0 = smov 128   ;;  %s1500_s3 = smov 8  }
  0x22   :  { %31 = dma.hbm_to_vmem [thread:$0]  %s1861_s1, 2048, %s1518_s12, [#allocation6], %s1499_s0, %s1499_s0, %s1500_s3  }
  0x23   :  { %1491 = dma.done.wait [#allocation3], 64  }
  0x24   :  { %1492 = vsyncadd [#allocation3], 4294967232 }
  0x25   :  { %1493 = dma.done.wait [#allocation6], 2048  }
  0x26   :  { %1494 = vsyncadd [#allocation6], 4294965248  ;;  %v39_v0 = vlaneseq  ;;  %v38_v5 = vld [vmem:[#allocation2] sm:$0xf]  ;;  %v392_v9 = vld [vmem:[#allocation5] sm:$0xff]  ;;  %v1501_v14 = vmov 0.0  }
  0x27   :  { %v393_v10 = vld [vmem:[#allocation5 + $0x8] sm:$0xff]  ;;  %s1502_s1 = smov [#allocation7]  }
  0x28   :  { %v1552_v1 = vshrl.u32 %v39_v0, 7  ;;  %v1147_v13 = vpack.c.bf16 %v393_v10, %v392_v9  ;;  %s862_s6 = sshll.u32 %s1502_s1, 4  ;;  %s863_s6 = int_to_ptr.vmem [resolvable:$true] %s862_s6 }
  0x29   :  { %s1469_s7 = scalar_lea.vmem %s863_s6, 8192  ;;  %p1474_p3 = scmp.lt.s32.totalorder %s863_s6, %s863_s6 }
  0x2a   :  { %v58_v2 = vsub.s32 0, %v1552_v1  ;;  %v66_v3 = vsub.s32 2, %v1552_v1  ;;  %v41_v4 = vadd.s32 8, %v1552_v1  ;;  %v1562_v8 = vadd.s32 16, %v1552_v1  ;;  %1148 = vmatprep.subr.bf16.mxu0 %v1147_v13  ;;  %1179 = vmatprep.subr.bf16.mxu1 %v1147_v13  ;;  %p1470_p2 = scmp.ne.s32.totalorder %s863_s6, %s1469_s7  ;;  %p1475_p4 = scmp.lt.s32.totalorder %s1469_s7, %s1469_s7 }
  0x2b   :  { %v1565_v11 = vadd.s32 24, %v1552_v1  ;;  %v62_v12 = vsub.s32 1, %v1552_v1  ;;  %v70_v20 = vsub.s32 3, %v1552_v1  ;;  %1150 = vmatpush3.bf16.msra.mxu0 %v1147_v13  ;;  %1187 = vmatpush3.bf16.msra.mxu1 %v1147_v13  ;;  %v44_v25 = vadd.s32 32, %v1552_v1 }
  0x2c   :  { %v1557_v6 = vrot.slane %v38_v5, %v58_v2  ;;  %v1559_v7 = vrot.slane %v38_v5, %v66_v3  ;;  %v1597_v30 = vadd.s32 40, %v1552_v1  ;;  %v46_v38 = vadd.s32 48, %v1552_v1  ;;  %p1476_p5 = por %p1475_p4, %p1474_p3 }
  0x2d   :  { %v1585_v24 = vrot.slane %v38_v5, %v62_v12  ;;  %v1592_v26 = vrot.slane %v38_v5, %v70_v20  ;;  %v47_v46 = vadd.s32 56, %v1552_v1  ;;  %v48_v53 = vadd.s32 64, %v1552_v1  ;;  %v395_v20 = vld [vmem:[#allocation5 + $0x18] sm:$0xff] }
  0x2e   :  { %vm72_vm0 = vcmp.eq.s32.totalorder %v1552_v1, %v1557_v6  ;;  %vm74_vm1 = vcmp.eq.s32.totalorder %v1552_v1, %v1559_v7  ;;  %vm76_vm2 = vcmp.eq.s32.totalorder %v41_v4, %v1557_v6  ;;  %vm78_vm3 = vcmp.eq.s32.totalorder %v41_v4, %v1559_v7  ;;  %p1477_p6 = pnand %p1476_p5, %p1470_p2 }
  0x2f   :  { %v875_v15 = vsel %vm72_vm0, 1.0, %v1501_v14  ;;  %v877_v16 = vsel %vm74_vm1, 1.0, %v1501_v14  ;;  %v879_v17 = vsel %vm76_vm2, 1.0, %v1501_v14  ;;  %v881_v18 = vsel %vm78_vm3, 1.0, %v1501_v14 }
  0x30   :  { %v1201_v19 = vpack.i.bf16 %v877_v16, %v875_v15  ;;  %vm80_vm4 = vcmp.eq.s32.totalorder %v1562_v8, %v1557_v6  ;;  %vm82_vm5 = vcmp.eq.s32.totalorder %v1562_v8, %v1559_v7  ;;  %v1203_v21 = vpack.i.bf16 %v881_v18, %v879_v17 }
  0x31   :  { %v883_v22 = vsel %vm80_vm4, 1.0, %v1501_v14  ;;  %v885_v23 = vsel %vm82_vm5, 1.0, %v1501_v14  ;;  %vm84_vm6 = vcmp.eq.s32.totalorder %v1565_v11, %v1557_v6  ;;  %vm86_vm7 = vcmp.eq.s32.totalorder %v1565_v11, %v1559_v7 }
  0x32   :  { %1202 = vxpose.xlu0.b32.start [1/16] %v1201_v19, 128  ;;  %v1205_v27 = vpack.i.bf16 %v885_v23, %v883_v22  ;;  %v887_v28 = vsel %vm84_vm6, 1.0, %v1501_v14  ;;  %v889_v29 = vsel %vm86_vm7, 1.0, %v1501_v14  ;;  %vm73_vm8 = vcmp.eq.s32.totalorder %v1552_v1, %v1585_v24  ;;  %v394_v19 = vld [vmem:[#allocation5 + $0x10] sm:$0xff]  ;;  %v396_v23 = vld [vmem:[#allocation5 + $0x20] sm:$0xff] }
  0x33   :  { %vm88_vm9 = vcmp.eq.s32.totalorder %v44_v25, %v1557_v6  ;;  %vm90_vm10 = vcmp.eq.s32.totalorder %v44_v25, %v1559_v7  ;;  %vm75_vm11 = vcmp.eq.s32.totalorder %v1552_v1, %v1592_v26  ;;  %v876_v31 = vsel %vm73_vm8, 1.0, %v1501_v14 }
  0x34   :  { %v878_v32 = vsel %vm75_vm11, 1.0, %v1501_v14  ;;  %vm77_vm12 = vcmp.eq.s32.totalorder %v41_v4, %v1585_v24  ;;  %v1207_v33 = vpack.i.bf16 %v889_v29, %v887_v28  ;;  %vm79_vm13 = vcmp.eq.s32.totalorder %v41_v4, %v1592_v26 }
  0x35   :  { %v1313_v34 = vpack.i.bf16 %v878_v32, %v876_v31  ;;  %v880_v35 = vsel %vm77_vm12, 1.0, %v1501_v14  ;;  %v891_v36 = vsel %vm88_vm9, 1.0, %v1501_v14  ;;  %v893_v37 = vsel %vm90_vm10, 1.0, %v1501_v14 }
  0x36   :  { %1204 = vxpose.xlu0.b32.cont [2/16] %v1203_v21, 128  ;;  %v882_v39 = vsel %vm79_vm13, 1.0, %v1501_v14  ;;  %vm92_vm14 = vcmp.eq.s32.totalorder %v1597_v30, %v1557_v6  ;;  %vm94_vm15 = vcmp.eq.s32.totalorder %v1597_v30, %v1559_v7  ;;  %vm81_vm0 = vcmp.eq.s32.totalorder %v1562_v8, %v1585_v24 }
  0x37   :  { %1314 = vxpose.xlu1.b32.start [1/16] %v1313_v34, 128  ;;  %v1315_v40 = vpack.i.bf16 %v882_v39, %v880_v35  ;;  %vm83_vm1 = vcmp.eq.s32.totalorder %v1562_v8, %v1592_v26  ;;  %v884_v41 = vsel %vm81_vm0, 1.0, %v1501_v14  ;;  %v1209_v42 = vpack.i.bf16 %v893_v37, %v891_v36  ;;  %v398_v34 = vld [vmem:[#allocation5 + $0x30] sm:$0xff]  ;;  %v399_v35 = vld [vmem:[#allocation5 + $0x38] sm:$0xff] }
  0x38   :  { %v886_v43 = vsel %vm83_vm1, 1.0, %v1501_v14  ;;  %vm85_vm2 = vcmp.eq.s32.totalorder %v1565_v11, %v1585_v24  ;;  %v895_v44 = vsel %vm92_vm14, 1.0, %v1501_v14  ;;  %v897_v45 = vsel %vm94_vm15, 1.0, %v1501_v14 }
  0x39   :  { %vm87_vm3 = vcmp.eq.s32.totalorder %v1565_v11, %v1592_v26  ;;  %vm96_vm4 = vcmp.eq.s32.totalorder %v46_v38, %v1557_v6  ;;  %vm98_vm5 = vcmp.eq.s32.totalorder %v46_v38, %v1559_v7  ;;  %v1317_v47 = vpack.i.bf16 %v886_v43, %v884_v41 }
  0x3a   :  { %1206 = vxpose.xlu0.b32.cont [3/16] %v1205_v27, 128  ;;  %v888_v48 = vsel %vm85_vm2, 1.0, %v1501_v14  ;;  %v890_v49 = vsel %vm87_vm3, 1.0, %v1501_v14  ;;  %v1211_v50 = vpack.i.bf16 %v897_v45, %v895_v44  ;;  %vm89_vm6 = vcmp.eq.s32.totalorder %v44_v25, %v1585_v24  ;;  %v400_v44 = vld [vmem:[#allocation5 + $0x40] sm:$0xff]  ;;  %v401_v45 = vld [vmem:[#allocation5 + $0x48] sm:$0xff] }
  0x3b   :  { %1316 = vxpose.xlu1.b32.cont [2/16] %v1315_v40, 128  ;;  %vm91_vm7 = vcmp.eq.s32.totalorder %v44_v25, %v1592_v26  ;;  %v899_v51 = vsel %vm96_vm4, 1.0, %v1501_v14  ;;  %v901_v52 = vsel %vm98_vm5, 1.0, %v1501_v14  ;;  %vm100_vm8 = vcmp.eq.s32.totalorder %v47_v46, %v1557_v6  ;;  %v397_v25 = vld [vmem:[#allocation5 + $0x28] sm:$0xff] }
  0x3c   :  { %vm102_vm9 = vcmp.eq.s32.totalorder %v47_v46, %v1559_v7  ;;  %v1319_v54 = vpack.i.bf16 %v890_v49, %v888_v48  ;;  %v892_v55 = vsel %vm89_vm6, 1.0, %v1501_v14  ;;  %v894_v56 = vsel %vm91_vm7, 1.0, %v1501_v14 }
  0x3d   :  { %v1213_v57 = vpack.i.bf16 %v901_v52, %v899_v51  ;;  %vm93_vm10 = vcmp.eq.s32.totalorder %v1597_v30, %v1585_v24  ;;  %vm95_vm11 = vcmp.eq.s32.totalorder %v1597_v30, %v1592_v26  ;;  %v903_v58 = vsel %vm100_vm8, 1.0, %v1501_v14 }
  0x3e   :  { %1208 = vxpose.xlu0.b32.cont [4/16] %v1207_v33, 128  ;;  %v905_v59 = vsel %vm102_vm9, 1.0, %v1501_v14  ;;  %vm104_vm12 = vcmp.eq.s32.totalorder %v48_v53, %v1557_v6  ;;  %vm106_vm13 = vcmp.eq.s32.totalorder %v48_v53, %v1559_v7  ;;  %v1653_v60 = vadd.s32 72, %v1552_v1 }
  0x3f   :  { %1318 = vxpose.xlu1.b32.cont [3/16] %v1317_v47, 128  ;;  %v1321_v61 = vpack.i.bf16 %v894_v56, %v892_v55  ;;  %v896_v62 = vsel %vm93_vm10, 1.0, %v1501_v14  ;;  %v898_v63 = vsel %vm95_vm11, 1.0, %v1501_v14  ;;  %v1215_v0 = vpack.i.bf16 %v905_v59, %v903_v58  ;;  %v403_v55 = vld [vmem:[#allocation5 + $0x58] sm:$0xff] }
  0x40   :  { %vm97_vm14 = vcmp.eq.s32.totalorder %v46_v38, %v1585_v24  ;;  %vm99_vm15 = vcmp.eq.s32.totalorder %v46_v38, %v1592_v26  ;;  %v907_v2 = vsel %vm104_vm12, 1.0, %v1501_v14  ;;  %v909_v3 = vsel %vm106_vm13, 1.0, %v1501_v14 }
  0x41   :  { %vm108_vm0 = vcmp.eq.s32.totalorder %v1653_v60, %v1557_v6  ;;  %vm110_vm1 = vcmp.eq.s32.totalorder %v1653_v60, %v1559_v7  ;;  %v1666_v4 = vadd.s32 80, %v1552_v1  ;;  %v1323_v5 = vpack.i.bf16 %v898_v63, %v896_v62 }
  0x42   :  { %1210 = vxpose.xlu0.b32.cont [5/16] %v1209_v42, 128  ;;  %v900_v8 = vsel %vm97_vm14, 1.0, %v1501_v14  ;;  %v902_v9 = vsel %vm99_vm15, 1.0, %v1501_v14  ;;  %v1217_v10 = vpack.i.bf16 %v909_v3, %v907_v2  ;;  %vm101_vm2 = vcmp.eq.s32.totalorder %v47_v46, %v1585_v24 }
  0x43   :  { %1320 = vxpose.xlu1.b32.cont [4/16] %v1319_v54, 128  ;;  %vm103_vm3 = vcmp.eq.s32.totalorder %v47_v46, %v1592_v26  ;;  %v911_v11 = vsel %vm108_vm0, 1.0, %v1501_v14  ;;  %v913_v12 = vsel %vm110_vm1, 1.0, %v1501_v14  ;;  %vm112_vm4 = vcmp.eq.s32.totalorder %v1666_v4, %v1557_v6  ;;  %v402_v54 = vld [vmem:[#allocation5 + $0x50] sm:$0xff] }
  0x44   :  { %vm114_vm5 = vcmp.eq.s32.totalorder %v1666_v4, %v1559_v7  ;;  %v1679_v13 = vadd.s32 88, %v1552_v1  ;;  %v1325_v15 = vpack.i.bf16 %v902_v9, %v900_v8  ;;  %v904_v16 = vsel %vm101_vm2, 1.0, %v1501_v14 }
  0x45   :  { %v906_v17 = vsel %vm103_vm3, 1.0, %v1501_v14  ;;  %v1219_v18 = vpack.i.bf16 %v913_v12, %v911_v11  ;;  %vm105_vm6 = vcmp.eq.s32.totalorder %v48_v53, %v1585_v24  ;;  %vm107_vm7 = vcmp.eq.s32.totalorder %v48_v53, %v1592_v26  ;;  %v406_v11 = vld [vmem:[#allocation5 + $0x70] sm:$0xff]  ;;  %v407_v12 = vld [vmem:[#allocation5 + $0x78] sm:$0xff] }
  0x46   :  { %1212 = vxpose.xlu0.b32.cont [6/16] %v1211_v50, 128  ;;  %v915_v21 = vsel %vm112_vm4, 1.0, %v1501_v14  ;;  %v917_v22 = vsel %vm114_vm5, 1.0, %v1501_v14  ;;  %vm116_vm8 = vcmp.eq.s32.totalorder %v1679_v13, %v1557_v6  ;;  %vm118_vm9 = vcmp.eq.s32.totalorder %v1679_v13, %v1559_v7 }
  0x47   :  { %1322 = vxpose.xlu1.b32.cont [5/16] %v1321_v61, 128  ;;  %v1692_v27 = vadd.s32 96, %v1552_v1  ;;  %v1327_v28 = vpack.i.bf16 %v906_v17, %v904_v16  ;;  %v908_v29 = vsel %vm105_vm6, 1.0, %v1501_v14  ;;  %v910_v30 = vsel %vm107_vm7, 1.0, %v1501_v14 }
  0x48   :  { %v1151_v31 = vpack.c.bf16 %v395_v20, %v394_v19  ;;  %v1221_v32 = vpack.i.bf16 %v917_v22, %v915_v21  ;;  %vm109_vm10 = vcmp.eq.s32.totalorder %v1653_v60, %v1585_v24  ;;  %vm111_vm11 = vcmp.eq.s32.totalorder %v1653_v60, %v1592_v26 }
  0x49   :  { %v1155_v33 = vpack.c.bf16 %v397_v25, %v396_v23  ;;  %v919_v36 = vsel %vm116_vm8, 1.0, %v1501_v14  ;;  %v921_v37 = vsel %vm118_vm9, 1.0, %v1501_v14  ;;  %vm120_vm12 = vcmp.eq.s32.totalorder %v1692_v27, %v1557_v6 }
  0x4a   :  { %1214 = vxpose.xlu0.b32.cont [7/16] %v1213_v57, 128  ;;  %1152 = vmatprep.subr.bf16.mxu0 %v1151_v31  ;;  %vm122_vm13 = vcmp.eq.s32.totalorder %v1692_v27, %v1559_v7  ;;  %v1707_v38 = vadd.s32 104, %v1552_v1  ;;  %v1329_v39 = vpack.i.bf16 %v910_v30, %v908_v29  ;;  %v912_v40 = vsel %vm109_vm10, 1.0, %v1501_v14 }
  0x4b   :  { %1324 = vxpose.xlu1.b32.cont [6/16] %v1323_v5, 128  ;;  %1180 = vmatprep.subr.bf16.mxu1 %v1151_v31  ;;  %v914_v41 = vsel %vm111_vm11, 1.0, %v1501_v14  ;;  %v1159_v42 = vpack.c.bf16 %v399_v35, %v398_v34  ;;  %v1223_v43 = vpack.i.bf16 %v921_v37, %v919_v36  ;;  %vm113_vm14 = vcmp.eq.s32.totalorder %v1666_v4, %v1585_v24 }
  0x4c   :  { %1154 = vmatpush3.bf16.msra.mxu0 %v1151_v31  ;;  %1188 = vmatpush3.bf16.msra.mxu1 %v1151_v31  ;;  %vm115_vm15 = vcmp.eq.s32.totalorder %v1666_v4, %v1592_v26  ;;  %v923_v46 = vsel %vm120_vm12, 1.0, %v1501_v14  ;;  %v925_v47 = vsel %vm122_vm13, 1.0, %v1501_v14  ;;  %vm124_vm0 = vcmp.eq.s32.totalorder %v1707_v38, %v1557_v6 }
  0x4d   :  { %1156 = vmatprep.subr.bf16.mxu0 %v1155_v33  ;;  %1181 = vmatprep.subr.bf16.mxu1 %v1155_v33  ;;  %vm126_vm1 = vcmp.eq.s32.totalorder %v1707_v38, %v1559_v7  ;;  %v1728_v48 = vadd.s32 112, %v1552_v1  ;;  %v1331_v49 = vpack.i.bf16 %v914_v41, %v912_v40  ;;  %v916_v50 = vsel %vm113_vm14, 1.0, %v1501_v14 }
  0x4e   :  { %1216 = vxpose.xlu0.b32.cont [8/16] %v1215_v0, 128  ;;  %v918_v51 = vsel %vm115_vm15, 1.0, %v1501_v14  ;;  %v1163_v52 = vpack.c.bf16 %v401_v45, %v400_v44  ;;  %v1225_v53 = vpack.i.bf16 %v925_v47, %v923_v46  ;;  %vm117_vm2 = vcmp.eq.s32.totalorder %v1679_v13, %v1585_v24  ;;  %v405_v0 = vld [vmem:[#allocation5 + $0x68] sm:$0xff] }
  0x4f   :  { %1326 = vxpose.xlu1.b32.cont [7/16] %v1325_v15, 128  ;;  %vm119_vm3 = vcmp.eq.s32.totalorder %v1679_v13, %v1592_v26  ;;  %v927_v56 = vsel %vm124_vm0, 1.0, %v1501_v14  ;;  %v929_v57 = vsel %vm126_vm1, 1.0, %v1501_v14  ;;  %vm128_vm4 = vcmp.eq.s32.totalorder %v1728_v48, %v1557_v6 }
  0x50   :  { %1158 = vmatpush3.bf16.msra.mxu0 %v1155_v33  ;;  %1189 = vmatpush3.bf16.msra.mxu1 %v1155_v33  ;;  %vm130_vm5 = vcmp.eq.s32.totalorder %v1728_v48, %v1559_v7  ;;  %v1749_v58 = vadd.s32 120, %v1552_v1  ;;  %v1333_v59 = vpack.i.bf16 %v918_v51, %v916_v50  ;;  %v920_v60 = vsel %vm117_vm2, 1.0, %v1501_v14  ;;  %v404_v1 = vld [vmem:[#allocation5 + $0x60] sm:$0xff] }
  0x51   :  { %1160 = vmatprep.subr.bf16.mxu0 %v1159_v42  ;;  %1182 = vmatprep.subr.bf16.mxu1 %v1159_v42  ;;  %v922_v61 = vsel %vm119_vm3, 1.0, %v1501_v14  ;;  %v1167_v62 = vpack.c.bf16 %v403_v55, %v402_v54  ;;  %v1227_v63 = vpack.i.bf16 %v929_v57, %v927_v56  ;;  %vm121_vm6 = vcmp.eq.s32.totalorder %v1692_v27, %v1585_v24 }
  0x52   :  { %1218 = vxpose.xlu0.b32.cont [9/16] %v1217_v10, 128  ;;  %vm123_vm7 = vcmp.eq.s32.totalorder %v1692_v27, %v1592_v26  ;;  %v931_v2 = vsel %vm128_vm4, 1.0, %v1501_v14  ;;  %v933_v3 = vsel %vm130_vm5, 1.0, %v1501_v14  ;;  %vm132_vm8 = vcmp.eq.s32.totalorder %v1749_v58, %v1557_v6 }
  0x53   :  { %1328 = vxpose.xlu1.b32.cont [8/16] %v1327_v28, 128  ;;  %vm134_vm9 = vcmp.eq.s32.totalorder %v1749_v58, %v1559_v7  ;;  %v1335_v4 = vpack.i.bf16 %v922_v61, %v920_v60  ;;  %v924_v5 = vsel %vm121_vm6, 1.0, %v1501_v14  ;;  %v926_v8 = vsel %vm123_vm7, 1.0, %v1501_v14 }
  0x54   :  { %1162 = vmatpush3.bf16.msra.mxu0 %v1159_v42  ;;  %1190 = vmatpush3.bf16.msra.mxu1 %v1159_v42  ;;  %v1171_v9 = vpack.c.bf16 %v405_v0, %v404_v1  ;;  %v1229_v10 = vpack.i.bf16 %v933_v3, %v931_v2  ;;  %vm125_vm10 = vcmp.eq.s32.totalorder %v1707_v38, %v1585_v24  ;;  %v935_v13 = vsel %vm132_vm8, 1.0, %v1501_v14 }
  0x55   :  { %1164 = vmatprep.subr.bf16.mxu0 %v1163_v52  ;;  %1183 = vmatprep.subr.bf16.mxu1 %v1163_v52  ;;  %vm127_vm11 = vcmp.eq.s32.totalorder %v1707_v38, %v1592_v26  ;;  %v937_v15 = vsel %vm134_vm9, 1.0, %v1501_v14  ;;  %v1337_v16 = vpack.i.bf16 %v926_v8, %v924_v5  ;;  %v928_v17 = vsel %vm125_vm10, 1.0, %v1501_v14 }
  0x56   :  { %1220 = vxpose.xlu0.b32.cont [10/16] %v1219_v18, 128  ;;  %v930_v18 = vsel %vm127_vm11, 1.0, %v1501_v14  ;;  %v1175_v19 = vpack.c.bf16 %v407_v12, %v406_v11  ;;  %v1231_v20 = vpack.i.bf16 %v937_v15, %v935_v13  ;;  %vm129_vm12 = vcmp.eq.s32.totalorder %v1728_v48, %v1585_v24 }
  0x57   :  { %1330 = vxpose.xlu1.b32.cont [9/16] %v1329_v39, 128  ;;  %vm131_vm13 = vcmp.eq.s32.totalorder %v1728_v48, %v1592_v26  ;;  %v1339_v6 = vpack.i.bf16 %v930_v18, %v928_v17  ;;  %v932_v7 = vsel %vm129_vm12, 1.0, %v1501_v14  ;;  %vm133_vm14 = vcmp.eq.s32.totalorder %v1749_v58, %v1585_v24 }
  0x58   :  { %1166 = vmatpush3.bf16.msra.mxu0 %v1163_v52  ;;  %1191 = vmatpush3.bf16.msra.mxu1 %v1163_v52  ;;  %v934_v21 = vsel %vm131_vm13, 1.0, %v1501_v14  ;;  %vm135_vm15 = vcmp.eq.s32.totalorder %v1749_v58, %v1592_v26  ;;  %v936_v23 = vsel %vm133_vm14, 1.0, %v1501_v14 }
  0x59   :  { %1168 = vmatprep.subr.bf16.mxu0 %v1167_v62  ;;  %1184 = vmatprep.subr.bf16.mxu1 %v1167_v62  ;;  %v1341_v22 = vpack.i.bf16 %v934_v21, %v932_v7  ;;  %v938_v25 = vsel %vm135_vm15, 1.0, %v1501_v14 }
  0x5a   :  { %1222 = vxpose.xlu0.b32.cont [11/16] %v1221_v32, 128  ;;  %v1343_v27 = vpack.i.bf16 %v938_v25, %v936_v23 }
  0x5b   :  { %1332 = vxpose.xlu1.b32.cont [10/16] %v1331_v49, 128 }
  0x5c   :  { %1170 = vmatpush3.bf16.msra.mxu0 %v1167_v62  ;;  %1192 = vmatpush3.bf16.msra.mxu1 %v1167_v62 }
  0x5d   :  { %1172 = vmatprep.subr.bf16.mxu0 %v1171_v9  ;;  %1185 = vmatprep.subr.bf16.mxu1 %v1171_v9 }
  0x5e   :  { %1224 = vxpose.xlu0.b32.cont [12/16] %v1223_v43, 128 }
  0x5f   :  { %1334 = vxpose.xlu1.b32.cont [11/16] %v1333_v59, 128 }
  0x60   :  { %1174 = vmatpush3.bf16.msra.mxu0 %v1171_v9  ;;  %1193 = vmatpush3.bf16.msra.mxu1 %v1171_v9 }
  0x61   :  { %1176 = vmatprep.subr.bf16.mxu0 %v1175_v19  ;;  %1186 = vmatprep.subr.bf16.mxu1 %v1175_v19 }
  0x62   :  { %1226 = vxpose.xlu0.b32.cont [13/16] %v1225_v53, 128 }
  0x63   :  { %1336 = vxpose.xlu1.b32.cont [12/16] %v1335_v4, 128 }
  0x64   :  { %1178 = vmatpush3.bf16.msra.mxu0 %v1175_v19  ;;  %1194 = vmatpush3.bf16.msra.mxu1 %v1175_v19 }
  0x66   :  { %1228 = vxpose.xlu0.b32.cont [14/16] %v1227_v63, 128 }
  0x67   :  { %1338 = vxpose.xlu1.b32.cont [13/16] %v1337_v16, 128 }
  0x6a   :  { %1230 = vxpose.xlu0.b32.cont [15/16] %v1229_v10, 128 }
  0x6b   :  { %1340 = vxpose.xlu1.b32.cont [14/16] %v1339_v6, 128 }
  0x6e   :  { %1232 = vxpose.xlu0.b32.end [16/16] %v1231_v20, 128 }
  0x6f   :  { %1342 = vxpose.xlu1.b32.cont [15/16] %v1341_v22, 128 }
  0x73   :  { %1344 = vxpose.xlu1.b32.end [16/16] %v1343_v27, 128 }
  0xb2   :  { %v1233_v28 = vpop.trf.xlu0 }
  0xb3   :  { %v1234_v29 = vunpack.i.l.bf16 %v1233_v28  ;;  %v1237_v30 = vunpack.i.h.bf16 %v1233_v28 }
  0xb5   :  { %1051 = vmatprep.mubr.f32.mxu0 %v1234_v29  ;;  %1099 = vmatprep.mubr.f32.mxu1 %v1237_v30 }
  0xb6   :  { %v1238_v24 = vpop.trf.xlu0 }
  0xb7   :  { %v1239_v31 = vunpack.i.l.bf16 %v1238_v24  ;;  %v1242_v26 = vunpack.i.h.bf16 %v1238_v24  ;;  %v1797_v35 = vpop.trf.xlu1 }
  0xb8   :  { %v1346_v23 = vunpack.i.l.bf16 %v1797_v35  ;;  %v1349_v25 = vunpack.i.h.bf16 %v1797_v35 }
  0xb9   :  { %1052 = vmatmul.mubr.f32.vlgmr.msra.gmra.mrb[0].mxu0 %v1239_v31  ;;  %1100 = vmatmul.mubr.f32.vlgmr.msra.gmra.mrb[0].mxu1 %v1242_v26 }
  0xba   :  { %v1243_v32 = vpop.trf.xlu0 }
  0xbb   :  { %v1244_v33 = vunpack.i.l.bf16 %v1243_v32  ;;  %v1247_v34 = vunpack.i.h.bf16 %v1243_v32  ;;  %v1799_v38 = vpop.trf.xlu1 }
  0xbc   :  { %v1351_v28 = vunpack.i.l.bf16 %v1799_v38  ;;  %v1354_v29 = vunpack.i.h.bf16 %v1799_v38 }
  0xbd   :  { %1054 = vmatprep.mubr.f32.mxu0 %v1244_v33  ;;  %1102 = vmatprep.mubr.f32.mxu1 %v1247_v34 }
  0xbe   :  { %v1248_v14 = vpop.trf.xlu0 }
  0xbf   :  { %v1249_v36 = vunpack.i.l.bf16 %v1248_v14  ;;  %v1252_v37 = vunpack.i.h.bf16 %v1248_v14  ;;  %v1801_v42 = vpop.trf.xlu1 }
  0xc0   :  { %v1356_v30 = vunpack.i.l.bf16 %v1801_v42  ;;  %v1359_v24 = vunpack.i.h.bf16 %v1801_v42 }
  0xc1   :  { %1055 = vmatmul.mubr.f32.gmra.mrb[2].mxu0 %v1249_v36  ;;  %1103 = vmatmul.mubr.f32.gmra.mrb[2].mxu1 %v1252_v37 }
  0xc2   :  { %v1253_v39 = vpop.trf.xlu0 }
  0xc3   :  { %v1254_v40 = vunpack.i.l.bf16 %v1253_v39  ;;  %v1257_v41 = vunpack.i.h.bf16 %v1253_v39  ;;  %v1803_v46 = vpop.trf.xlu1 }
  0xc4   :  { %v1361_v26 = vunpack.i.l.bf16 %v1803_v46  ;;  %v1364_v32 = vunpack.i.h.bf16 %v1803_v46 }
  0xc5   :  { %1057 = vmatprep.mubr.f32.mxu0 %v1254_v40  ;;  %1105 = vmatprep.mubr.f32.mxu1 %v1257_v41 }
  0xc6   :  { %v1258_v43 = vpop.trf.xlu0 }
  0xc7   :  { %v1259_v44 = vunpack.i.l.bf16 %v1258_v43  ;;  %v1262_v45 = vunpack.i.h.bf16 %v1258_v43  ;;  %v1805_v50 = vpop.trf.xlu1 }
  0xc8   :  { %v1366_v33 = vunpack.i.l.bf16 %v1805_v50  ;;  %v1369_v34 = vunpack.i.h.bf16 %v1805_v50 }
  0xc9   :  { %1058 = vmatmul.mubr.f32.gmra.mrb[4].mxu0 %v1259_v44  ;;  %1106 = vmatmul.mubr.f32.gmra.mrb[4].mxu1 %v1262_v45 }
  0xca   :  { %v1263_v47 = vpop.trf.xlu0 }
  0xcb   :  { %v1264_v48 = vunpack.i.l.bf16 %v1263_v47  ;;  %v1267_v49 = vunpack.i.h.bf16 %v1263_v47  ;;  %v1807_v54 = vpop.trf.xlu1 }
  0xcc   :  { %v1371_v14 = vunpack.i.l.bf16 %v1807_v54  ;;  %v1374_v36 = vunpack.i.h.bf16 %v1807_v54 }
  0xcd   :  { %1060 = vmatprep.mubr.f32.mxu0 %v1264_v48  ;;  %1108 = vmatprep.mubr.f32.mxu1 %v1267_v49 }
  0xce   :  { %v1268_v51 = vpop.trf.xlu0 }
  0xcf   :  { %v1269_v52 = vunpack.i.l.bf16 %v1268_v51  ;;  %v1272_v53 = vunpack.i.h.bf16 %v1268_v51  ;;  %v1809_v58 = vpop.trf.xlu1 }
  0xd0   :  { %v1376_v37 = vunpack.i.l.bf16 %v1809_v58  ;;  %v1379_v38 = vunpack.i.h.bf16 %v1809_v58 }
  0xd1   :  { %1061 = vmatmul.mubr.f32.gmra.mrb[6].mxu0 %v1269_v52  ;;  %1109 = vmatmul.mubr.f32.gmra.mrb[6].mxu1 %v1272_v53 }
  0xd2   :  { %v1273_v55 = vpop.trf.xlu0 }
  0xd3   :  { %v1274_v56 = vunpack.i.l.bf16 %v1273_v55  ;;  %v1277_v57 = vunpack.i.h.bf16 %v1273_v55  ;;  %v1811_v62 = vpop.trf.xlu1 }
  0xd4   :  { %v1381_v39 = vunpack.i.l.bf16 %v1811_v62  ;;  %v1384_v40 = vunpack.i.h.bf16 %v1811_v62 }
  0xd5   :  { %1063 = vmatprep.mubr.f32.mxu0 %v1274_v56  ;;  %1111 = vmatprep.mubr.f32.mxu1 %v1277_v57 }
  0xd6   :  { %v1278_v59 = vpop.trf.xlu0 }
  0xd7   :  { %v1279_v60 = vunpack.i.l.bf16 %v1278_v59  ;;  %v1282_v61 = vunpack.i.h.bf16 %v1278_v59  ;;  %v1813_v2 = vpop.trf.xlu1 }
  0xd8   :  { %v1386_v41 = vunpack.i.l.bf16 %v1813_v2  ;;  %v1389_v42 = vunpack.i.h.bf16 %v1813_v2 }
  0xd9   :  { %1064 = vmatmul.mubr.f32.gmra.mrb[8].mxu0 %v1279_v60  ;;  %1112 = vmatmul.mubr.f32.gmra.mrb[8].mxu1 %v1282_v61 }
  0xda   :  { %v1283_v63 = vpop.trf.xlu0 }
  0xdb   :  { %v1284_v1 = vunpack.i.l.bf16 %v1283_v63  ;;  %v1287_v0 = vunpack.i.h.bf16 %v1283_v63  ;;  %v1815_v8 = vpop.trf.xlu1 }
  0xdc   :  { %v1391_v43 = vunpack.i.l.bf16 %v1815_v8  ;;  %v1394_v44 = vunpack.i.h.bf16 %v1815_v8 }
  0xdd   :  { %1066 = vmatprep.mubr.f32.mxu0 %v1284_v1  ;;  %1114 = vmatprep.mubr.f32.mxu1 %v1287_v0 }
  0xde   :  { %v1288_v3 = vpop.trf.xlu0 }
  0xdf   :  { %v1289_v4 = vunpack.i.l.bf16 %v1288_v3  ;;  %v1292_v5 = vunpack.i.h.bf16 %v1288_v3  ;;  %v1817_v12 = vpop.trf.xlu1 }
  0xe0   :  { %v1396_v45 = vunpack.i.l.bf16 %v1817_v12  ;;  %v1399_v46 = vunpack.i.h.bf16 %v1817_v12 }
  0xe1   :  { %1067 = vmatmul.mubr.f32.gmra.mrb[10].mxu0 %v1289_v4  ;;  %1115 = vmatmul.mubr.f32.gmra.mrb[10].mxu1 %v1292_v5 }
  0xe2   :  { %v1293_v9 = vpop.trf.xlu0 }
  0xe3   :  { %v1294_v10 = vunpack.i.l.bf16 %v1293_v9  ;;  %v1297_v11 = vunpack.i.h.bf16 %v1293_v9  ;;  %v1819_v17 = vpop.trf.xlu1 }
  0xe4   :  { %v1401_v47 = vunpack.i.l.bf16 %v1819_v17  ;;  %v1404_v48 = vunpack.i.h.bf16 %v1819_v17 }
  0xe5   :  { %1069 = vmatprep.mubr.f32.mxu0 %v1294_v10  ;;  %1117 = vmatprep.mubr.f32.mxu1 %v1297_v11 }
  0xe6   :  { %v1298_v13 = vpop.trf.xlu0 }
  0xe7   :  { %v1299_v15 = vunpack.i.l.bf16 %v1298_v13  ;;  %v1302_v16 = vunpack.i.h.bf16 %v1298_v13  ;;  %v1405_v6 = vpop.trf.xlu1 }
  0xe8   :  { %v1406_v49 = vunpack.i.l.bf16 %v1405_v6  ;;  %v1409_v50 = vunpack.i.h.bf16 %v1405_v6 }
  0xe9   :  { %1070 = vmatmul.mubr.f32.gmra.mrb[12].mxu0 %v1299_v15  ;;  %1118 = vmatmul.mubr.f32.gmra.mrb[12].mxu1 %v1302_v16 }
  0xea   :  { %v1303_v18 = vpop.trf.xlu0 }
  0xeb   :  { %v1304_v19 = vunpack.i.l.bf16 %v1303_v18  ;;  %v1307_v20 = vunpack.i.h.bf16 %v1303_v18  ;;  %v1410_v27 = vpop.trf.xlu1 }
  0xec   :  { %v1411_v53 = vunpack.i.l.bf16 %v1410_v27  ;;  %v1414_v54 = vunpack.i.h.bf16 %v1410_v27 }
  0xed   :  { %1072 = vmatprep.mubr.f32.mxu0 %v1304_v19  ;;  %1120 = vmatprep.mubr.f32.mxu1 %v1307_v20 }
  0xee   :  { %v1308_v7 = vpop.trf.xlu0 }
  0xef   :  { %v1312_v21 = vunpack.i.h.bf16 %v1308_v7  ;;  %v1309_v22 = vunpack.i.l.bf16 %v1308_v7  ;;  %v1415_v31 = vpop.trf.xlu1 }
  0xf0   :  { %v1416_v51 = vunpack.i.l.bf16 %v1415_v31  ;;  %v1419_v52 = vunpack.i.h.bf16 %v1415_v31 }
  0xf1   :  { %1073 = vmatmul.mubr.f32.gmra.mrb[14].mxu0 %v1309_v22  ;;  %1121 = vmatmul.mubr.f32.gmra.mrb[14].mxu1 %v1312_v21 }
  0xf2   :  { %1075 = vmatprep.mubr.f32.mxu0 %v1346_v23  ;;  %1123 = vmatprep.mubr.f32.mxu1 %v1349_v25 }
  0xf3   :  { %v1420_v35 = vpop.trf.xlu1 }
  0xf4   :  { %v1424_v55 = vunpack.i.h.bf16 %v1420_v35  ;;  %v1421_v56 = vunpack.i.l.bf16 %v1420_v35 }
  0xf5   :  { %1076 = vmatmul.mubr.f32.gmra.mrb[16].mxu0 %v1351_v28  ;;  %1124 = vmatmul.mubr.f32.gmra.mrb[16].mxu1 %v1354_v29 }
  0xf6   :  { %1078 = vmatprep.mubr.f32.mxu0 %v1356_v30  ;;  %1126 = vmatprep.mubr.f32.mxu1 %v1359_v24 }
  0xf9   :  { %1079 = vmatmul.mubr.f32.gmra.mrb[18].mxu0 %v1361_v26  ;;  %1127 = vmatmul.mubr.f32.gmra.mrb[18].mxu1 %v1364_v32 }
  0xfa   :  { %1081 = vmatprep.mubr.f32.mxu0 %v1366_v33  ;;  %1129 = vmatprep.mubr.f32.mxu1 %v1369_v34 }
  0xfd   :  { %1082 = vmatmul.mubr.f32.gmra.mrb[20].mxu0 %v1371_v14  ;;  %1130 = vmatmul.mubr.f32.gmra.mrb[20].mxu1 %v1374_v36 }
  0xfe   :  { %1084 = vmatprep.mubr.f32.mxu0 %v1376_v37  ;;  %1132 = vmatprep.mubr.f32.mxu1 %v1379_v38 }
 0x101   :  { %1085 = vmatmul.mubr.f32.gmra.mrb[22].mxu0 %v1381_v39  ;;  %1133 = vmatmul.mubr.f32.gmra.mrb[22].mxu1 %v1384_v40 }
 0x102   :  { %1087 = vmatprep.mubr.f32.mxu0 %v1386_v41  ;;  %1135 = vmatprep.mubr.f32.mxu1 %v1389_v42 }
 0x105   :  { %1088 = vmatmul.mubr.f32.gmra.mrb[24].mxu0 %v1391_v43  ;;  %1136 = vmatmul.mubr.f32.gmra.mrb[24].mxu1 %v1394_v44 }
 0x106   :  { %1090 = vmatprep.mubr.f32.mxu0 %v1396_v45  ;;  %1138 = vmatprep.mubr.f32.mxu1 %v1399_v46 }
 0x109   :  { %1091 = vmatmul.mubr.f32.gmra.mrb[26].mxu0 %v1401_v47  ;;  %1139 = vmatmul.mubr.f32.gmra.mrb[26].mxu1 %v1404_v48 }
 0x10a   :  { %1093 = vmatprep.mubr.f32.mxu0 %v1406_v49  ;;  %1141 = vmatprep.mubr.f32.mxu1 %v1409_v50 }
 0x10d   :  { %1094 = vmatmul.mubr.f32.gmra.mrb[28].mxu0 %v1411_v53  ;;  %1142 = vmatmul.mubr.f32.gmra.mrb[28].mxu1 %v1414_v54 }
 0x10e   :  { %1096 = vmatprep.mubr.f32.mxu0 %v1416_v51  ;;  %1144 = vmatprep.mubr.f32.mxu1 %v1419_v52 }
 0x111   :  { %1097 = vmatmul.mubr.f32.gmra.mrb[30].mxu0 %v1421_v56  ;;  %1145 = vmatmul.mubr.f32.gmra.mrb[30].mxu1 %v1424_v55 }
 0x18c   :  { %v1053_v57 = vpop.f32.mrb[0].mxu0  ;;  %v1101_v58 = vpop.f32.mrb[0].mxu1 }
 0x18d   :  { %794 = vst [vmem:[#allocation7 + $0x8] sm:$0xff] %v1053_v57  ;;  %826 = vst [vmem:[#allocation7 + $0x108] sm:$0xff] %v1101_v58  ;;  %v474_v59 = vpop.f32.mrb[1].mxu0  ;;  %v634_v60 = vpop.f32.mrb[1].mxu1 }
 0x18e   :  { %793 = vst [vmem:[#allocation7] sm:$0xff] %v474_v59  ;;  %825 = vst [vmem:[#allocation7 + $0x100] sm:$0xff] %v634_v60 }
 0x194   :  { %v1056_v61 = vpop.f32.mrb[2].mxu0  ;;  %v1104_v62 = vpop.f32.mrb[2].mxu1 }
 0x195   :  { %796 = vst [vmem:[#allocation7 + $0x18] sm:$0xff] %v1056_v61  ;;  %828 = vst [vmem:[#allocation7 + $0x118] sm:$0xff] %v1104_v62  ;;  %v484_v63 = vpop.f32.mrb[3].mxu0  ;;  %v644_v1 = vpop.f32.mrb[3].mxu1 }
 0x196   :  { %795 = vst [vmem:[#allocation7 + $0x10] sm:$0xff] %v484_v63  ;;  %827 = vst [vmem:[#allocation7 + $0x110] sm:$0xff] %v644_v1 }
 0x19c   :  { %v1059_v0 = vpop.f32.mrb[4].mxu0  ;;  %v1107_v2 = vpop.f32.mrb[4].mxu1 }
 0x19d   :  { %798 = vst [vmem:[#allocation7 + $0x28] sm:$0xff] %v1059_v0  ;;  %830 = vst [vmem:[#allocation7 + $0x128] sm:$0xff] %v1107_v2  ;;  %v494_v3 = vpop.f32.mrb[5].mxu0  ;;  %v654_v4 = vpop.f32.mrb[5].mxu1 }
 0x19e   :  { %797 = vst [vmem:[#allocation7 + $0x20] sm:$0xff] %v494_v3  ;;  %829 = vst [vmem:[#allocation7 + $0x120] sm:$0xff] %v654_v4 }
 0x1a4   :  { %v1062_v5 = vpop.f32.mrb[6].mxu0  ;;  %v1110_v8 = vpop.f32.mrb[6].mxu1 }
 0x1a5   :  { %800 = vst [vmem:[#allocation7 + $0x38] sm:$0xff] %v1062_v5  ;;  %832 = vst [vmem:[#allocation7 + $0x138] sm:$0xff] %v1110_v8  ;;  %v504_v9 = vpop.f32.mrb[7].mxu0  ;;  %v664_v10 = vpop.f32.mrb[7].mxu1 }
 0x1a6   :  { %799 = vst [vmem:[#allocation7 + $0x30] sm:$0xff] %v504_v9  ;;  %831 = vst [vmem:[#allocation7 + $0x130] sm:$0xff] %v664_v10 }
 0x1ac   :  { %v1065_v11 = vpop.f32.mrb[8].mxu0  ;;  %v1113_v12 = vpop.f32.mrb[8].mxu1 }
 0x1ad   :  { %802 = vst [vmem:[#allocation7 + $0x48] sm:$0xff] %v1065_v11  ;;  %834 = vst [vmem:[#allocation7 + $0x148] sm:$0xff] %v1113_v12  ;;  %v514_v13 = vpop.f32.mrb[9].mxu0  ;;  %v674_v15 = vpop.f32.mrb[9].mxu1 }
 0x1ae   :  { %801 = vst [vmem:[#allocation7 + $0x40] sm:$0xff] %v514_v13  ;;  %833 = vst [vmem:[#allocation7 + $0x140] sm:$0xff] %v674_v15 }
 0x1b4   :  { %v1068_v16 = vpop.f32.mrb[10].mxu0  ;;  %v1116_v17 = vpop.f32.mrb[10].mxu1 }
 0x1b5   :  { %804 = vst [vmem:[#allocation7 + $0x58] sm:$0xff] %v1068_v16  ;;  %836 = vst [vmem:[#allocation7 + $0x158] sm:$0xff] %v1116_v17  ;;  %v524_v18 = vpop.f32.mrb[11].mxu0  ;;  %v684_v19 = vpop.f32.mrb[11].mxu1 }
 0x1b6   :  { %803 = vst [vmem:[#allocation7 + $0x50] sm:$0xff] %v524_v18  ;;  %835 = vst [vmem:[#allocation7 + $0x150] sm:$0xff] %v684_v19 }
 0x1bc   :  { %v1071_v20 = vpop.f32.mrb[12].mxu0  ;;  %v1119_v6 = vpop.f32.mrb[12].mxu1 }
 0x1bd   :  { %806 = vst [vmem:[#allocation7 + $0x68] sm:$0xff] %v1071_v20  ;;  %838 = vst [vmem:[#allocation7 + $0x168] sm:$0xff] %v1119_v6  ;;  %v534_v7 = vpop.f32.mrb[13].mxu0  ;;  %v694_v21 = vpop.f32.mrb[13].mxu1 }
 0x1be   :  { %805 = vst [vmem:[#allocation7 + $0x60] sm:$0xff] %v534_v7  ;;  %837 = vst [vmem:[#allocation7 + $0x160] sm:$0xff] %v694_v21 }
 0x1c4   :  { %v1074_v22 = vpop.f32.mrb[14].mxu0  ;;  %v1122_v23 = vpop.f32.mrb[14].mxu1 }
 0x1c5   :  { %808 = vst [vmem:[#allocation7 + $0x78] sm:$0xff] %v1074_v22  ;;  %840 = vst [vmem:[#allocation7 + $0x178] sm:$0xff] %v1122_v23  ;;  %v544_v25 = vpop.f32.mrb[15].mxu0  ;;  %v704_v27 = vpop.f32.mrb[15].mxu1 }
 0x1c6   :  { %807 = vst [vmem:[#allocation7 + $0x70] sm:$0xff] %v544_v25  ;;  %839 = vst [vmem:[#allocation7 + $0x170] sm:$0xff] %v704_v27 }
 0x1c8   :  { %v1077_v28 = vpop.f32.mrb[16].mxu0  ;;  %v1125_v29 = vpop.f32.mrb[16].mxu1 }
 0x1c9   :  { %810 = vst [vmem:[#allocation7 + $0x88] sm:$0xff] %v1077_v28  ;;  %842 = vst [vmem:[#allocation7 + $0x188] sm:$0xff] %v1125_v29  ;;  %v554_v30 = vpop.f32.mrb[17].mxu0  ;;  %v714_v24 = vpop.f32.mrb[17].mxu1 }
 0x1ca   :  { %809 = vst [vmem:[#allocation7 + $0x80] sm:$0xff] %v554_v30  ;;  %841 = vst [vmem:[#allocation7 + $0x180] sm:$0xff] %v714_v24 }
 0x1cc   :  { %v1080_v31 = vpop.f32.mrb[18].mxu0  ;;  %v1128_v26 = vpop.f32.mrb[18].mxu1 }
 0x1cd   :  { %812 = vst [vmem:[#allocation7 + $0x98] sm:$0xff] %v1080_v31  ;;  %844 = vst [vmem:[#allocation7 + $0x198] sm:$0xff] %v1128_v26  ;;  %v564_v32 = vpop.f32.mrb[19].mxu0  ;;  %v724_v33 = vpop.f32.mrb[19].mxu1 }
 0x1ce   :  { %811 = vst [vmem:[#allocation7 + $0x90] sm:$0xff] %v564_v32  ;;  %843 = vst [vmem:[#allocation7 + $0x190] sm:$0xff] %v724_v33 }
 0x1d0   :  { %v1083_v34 = vpop.f32.mrb[20].mxu0  ;;  %v1131_v35 = vpop.f32.mrb[20].mxu1 }
 0x1d1   :  { %814 = vst [vmem:[#allocation7 + $0xa8] sm:$0xff] %v1083_v34  ;;  %846 = vst [vmem:[#allocation7 + $0x1a8] sm:$0xff] %v1131_v35  ;;  %v574_v14 = vpop.f32.mrb[21].mxu0  ;;  %v734_v36 = vpop.f32.mrb[21].mxu1 }
 0x1d2   :  { %813 = vst [vmem:[#allocation7 + $0xa0] sm:$0xff] %v574_v14  ;;  %845 = vst [vmem:[#allocation7 + $0x1a0] sm:$0xff] %v734_v36 }
 0x1d4   :  { %v1086_v37 = vpop.f32.mrb[22].mxu0  ;;  %v1134_v38 = vpop.f32.mrb[22].mxu1 }
 0x1d5   :  { %816 = vst [vmem:[#allocation7 + $0xb8] sm:$0xff] %v1086_v37  ;;  %848 = vst [vmem:[#allocation7 + $0x1b8] sm:$0xff] %v1134_v38  ;;  %v584_v39 = vpop.f32.mrb[23].mxu0  ;;  %v744_v40 = vpop.f32.mrb[23].mxu1 }
 0x1d6   :  { %815 = vst [vmem:[#allocation7 + $0xb0] sm:$0xff] %v584_v39  ;;  %847 = vst [vmem:[#allocation7 + $0x1b0] sm:$0xff] %v744_v40 }
 0x1d8   :  { %v1089_v41 = vpop.f32.mrb[24].mxu0  ;;  %v1137_v42 = vpop.f32.mrb[24].mxu1 }
 0x1d9   :  { %818 = vst [vmem:[#allocation7 + $0xc8] sm:$0xff] %v1089_v41  ;;  %850 = vst [vmem:[#allocation7 + $0x1c8] sm:$0xff] %v1137_v42  ;;  %v594_v43 = vpop.f32.mrb[25].mxu0  ;;  %v754_v44 = vpop.f32.mrb[25].mxu1 }
 0x1da   :  { %817 = vst [vmem:[#allocation7 + $0xc0] sm:$0xff] %v594_v43  ;;  %849 = vst [vmem:[#allocation7 + $0x1c0] sm:$0xff] %v754_v44 }
 0x1dc   :  { %v1092_v45 = vpop.f32.mrb[26].mxu0  ;;  %v1140_v46 = vpop.f32.mrb[26].mxu1 }
 0x1dd   :  { %820 = vst [vmem:[#allocation7 + $0xd8] sm:$0xff] %v1092_v45  ;;  %852 = vst [vmem:[#allocation7 + $0x1d8] sm:$0xff] %v1140_v46  ;;  %v604_v47 = vpop.f32.mrb[27].mxu0  ;;  %v764_v48 = vpop.f32.mrb[27].mxu1 }
 0x1de   :  { %819 = vst [vmem:[#allocation7 + $0xd0] sm:$0xff] %v604_v47  ;;  %851 = vst [vmem:[#allocation7 + $0x1d0] sm:$0xff] %v764_v48 }
 0x1e0   :  { %v1095_v49 = vpop.f32.mrb[28].mxu0  ;;  %v1143_v50 = vpop.f32.mrb[28].mxu1 }
 0x1e1   :  { %822 = vst [vmem:[#allocation7 + $0xe8] sm:$0xff] %v1095_v49  ;;  %854 = vst [vmem:[#allocation7 + $0x1e8] sm:$0xff] %v1143_v50  ;;  %v614_v51 = vpop.f32.mrb[29].mxu0  ;;  %v774_v52 = vpop.f32.mrb[29].mxu1 }
 0x1e2   :  { %821 = vst [vmem:[#allocation7 + $0xe0] sm:$0xff] %v614_v51  ;;  %853 = vst [vmem:[#allocation7 + $0x1e0] sm:$0xff] %v774_v52 }
 0x1e4   :  { %v1098_v53 = vpop.f32.mrb[30].mxu0  ;;  %v1146_v54 = vpop.f32.mrb[30].mxu1 }
 0x1e5   :  { %824 = vst [vmem:[#allocation7 + $0xf8] sm:$0xff] %v1098_v53  ;;  %856 = vst [vmem:[#allocation7 + $0x1f8] sm:$0xff] %v1146_v54  ;;  %v624_v55 = vpop.f32.mrb[31].mxu0  ;;  %v784_v56 = vpop.f32.mrb[31].mxu1 }
 0x1e6   :  { %823 = vst [vmem:[#allocation7 + $0xf0] sm:$0xff] %v624_v55  ;;  %855 = vst [vmem:[#allocation7 + $0x1f0] sm:$0xff] %v784_v56 }
 0x1e7   :  { %1480 = shalt.err (!%p1477_p6)
}
 0x1e8   :  { %s1481_s10 = scalar_lea.hbm %s1862_s2, 8192 }
 0x1e9   :  { %p1482_p7 = scmp.ne.s32.totalorder %s1862_s2, %s1481_s10  ;;  %p1485_p8 = scmp.lt.u32.totalorder %s1481_s10, %s1862_s2 }
 0x1eb   :  { %p1487_p9 = pnand %p1485_p8, %p1482_p7 }
 0x1ed   :  { %1490 = shalt.err (!%p1487_p9)
}
 0x1ee   :  { %868 = dma.vmem_to_hbm [thread:$0]  %s863_s6, 8192, %s1862_s2, [#allocation4], %s1499_s0, %s1499_s0, %s1500_s3  }
 0x1ef   :  { %1495 = dma.done.wait [#allocation4], 8192  }
 0x1f0   :  { %1496 = vsyncadd [#allocation4], 4294959104 }
 0x1f1   :  { %872 = vsyncpa [#allocation3], 1 }
 0x1f2   :  { %873 = vsyncpa [#allocation6], 1 }
 0x1f3   :  { %874 = vsyncpa [#allocation4], 1 }

</bundles_post_ra>
